<compile_context>
chip_gen: v7x
topology: tpu7x:2x2x1
jax: 0.10.0
libtpu: 0.0.40
codegen_flags: <defaults>
</compile_context>

<pallas_src>
import jax
import jax.numpy as jnp
import numpy as np
from jax.experimental import pallas as pl
from jax.experimental.pallas import tpu as pltpu

EPS = 1e-5  # nn.GroupNorm default


def _round_up(x, m):
    return ((x + m - 1) // m) * m


def _cond_gen_kernel(num_x_ref, cat_ids_ref, w_num_ref, w_cat_ref, b_ref, out_ref):
    n_cat = cat_ids_ref.shape[1]
    vocab_pad = w_cat_ref.shape[0]

    # ---- numerical branch: one tiny-K MXU matmul (block-expanded weight) ----
    acc = jnp.dot(num_x_ref[...], w_num_ref[...],
                  preferred_element_type=jnp.float32)

    # ---- categorical branch: one multi-hot matmul ---------------------------
    # Per-group id ranges are disjoint (categorical_offset), so a single
    # multi-hot row selects every group's fused (GroupNorm+affine+conv) row.
    # NOTE: out-of-range / negative ids would select nothing (zero row) and
    # silently diverge from PyTorch, which would raise.
    ids = cat_ids_ref[...]                                         # (bt, n_cat) i32
    bt = ids.shape[0]
    iota_v = jax.lax.broadcasted_iota(jnp.int32, (bt, vocab_pad), 1)
    mh = (ids[:, 0:1] == iota_v).astype(jnp.float32)
    for g in range(1, n_cat):
        mh = mh + (ids[:, g:g + 1] == iota_v).astype(jnp.float32)
    # TODO(synk): for very large vocabularies (multi-hot / fused table no
    # longer VMEM friendly, esp. v7x's 64 MiB VMEM) switch this to a manual
    # DMA row gather instead of the multi-hot matmul.
    acc = acc + jnp.dot(mh, w_cat_ref[...],
                        preferred_element_type=jnp.float32)

    # ---- one fused bias + sigmoid + full-width unmasked lane-dense store ----
    out_ref[...] = jax.nn.sigmoid(acc + b_ref[...])


def condition_generation(x, params, numerical_index, categorical_index,
                         categorical_offset, *, n_cond, batch_tile=1024):
    """Pallas implementation of ConditionGeneration.forward (both branches)."""
    B = x.shape[0]
    n_num = len(numerical_index)
    n_cat = len(categorical_index)
    assert n_num > 0 and n_cat > 0
    n_feat = n_num + n_cat
    out_w = n_feat * n_cond
    out_w_pad = _round_up(out_w, 128)          # unmasked lane-dense stores

    # ---- feature split (cheap, wrapper-side) -------------------------------
    num_x = x[:, jnp.asarray(numerical_index)].astype(jnp.float32)       # (B, n_num)
    cat_ids = (x[:, jnp.asarray(categorical_index)].astype(jnp.int32)
               + jnp.asarray(categorical_offset).astype(jnp.int32)[None, :])  # (B, n_cat)

    # ---- batch tiling: big tiles; grid >= 2 when B allows (v7x dual TC) ----
    bt = min(batch_tile, _round_up(B, 8))
    if B >= 16:
        bt = min(bt, _round_up((B + 1) // 2, 8))
    bt = max(bt, 8)
    B_pad = _round_up(B, bt)
    if B_pad != B:
        num_x = jnp.pad(num_x, ((0, B_pad - B), (0, 0)))
        cat_ids = jnp.pad(cat_ids, ((0, B_pad - B), (0, 0)))             # id 0 is valid

    # ---- one-time weight re-arrangements (plain JAX, outside the kernel) ---
    f32 = jnp.float32
    w_num = params['w_num'].astype(f32)          # (n_num, n_cond)
    b_num = params['b_num'].astype(f32)          # (n_num, n_cond)
    emb = params['emb'].astype(f32)              # (vocab, n_cond)
    gamma = params['gamma'].astype(f32)          # (n_cat, n_cond)
    beta = params['beta'].astype(f32)            # (n_cat, n_cond)
    W_cat = params['W_cat'].astype(f32)          # (n_cat, out, in)
    b_cat = params['b_cat'].astype(f32)          # (n_cat, out)
    vocab = emb.shape[0]
    vocab_pad = _round_up(vocab, 8)

    # GroupNorm pre-applied to the embedding table (exact: each group's n_cond
    # channels come from exactly one embedding row); biased variance like torch.
    mu = emb.mean(-1, keepdims=True)
    var = ((emb - mu) ** 2).mean(-1, keepdims=True)
    emb_norm = (emb - mu) * jax.lax.rsqrt(var + EPS)                     # (vocab, n_cond)

    # Group membership of each vocab row (from the offsets).
    offs = np.asarray(categorical_offset).astype(np.int64)
    bounds = np.concatenate([offs, np.array([vocab], np.int64)])
    group_of_v = np.searchsorted(bounds, np.arange(vocab), side='right') - 1

    # Fold gamma into the grouped 1x1 conv weight and beta into its bias, then
    # fuse (normalized embedding row) @ (grouped conv) into one per-vocab row.
    W_eff = W_cat * gamma[:, None, :]                                    # (n_cat, out, in)
    W_row = jnp.einsum('vi,voi->vo', emb_norm, W_eff[group_of_v])        # (vocab, out)
    b_eff = b_cat + jnp.einsum('gi,goi->go', beta, W_cat)                # (n_cat, out)

    # Natural (feature-major) layout; numeric features first, then categorical.
    eye_num = jnp.eye(n_num, dtype=f32)
    W_num_nat = jnp.concatenate(
        [eye_num[:, :, None] * w_num[None, :, :],
         jnp.zeros((n_num, n_cat, n_cond), f32)], axis=1)                # (n_num, n_feat, n_cond)
    gsel = jnp.asarray(group_of_v[:, None] == np.arange(n_cat)[None, :], f32)
    W_cat_nat = jnp.concatenate(
        [jnp.zeros((vocab, n_num, n_cond), f32),
         gsel[:, :, None] * W_row[:, None, :]], axis=1)                  # (vocab, n_feat, n_cond)
    b_nat = jnp.concatenate([b_num, b_eff], axis=0)                      # (n_feat, n_cond)

    # Column-permute so the kernel writes the FINAL (B, n_cond*n_feat) layout
    # directly (no output transpose / extra HBM pass), then pad to 128 lanes.
    def to_out_cols(w):
        w = jnp.swapaxes(w, -1, -2)
        return w.reshape(w.shape[:-2] + (out_w,))

    def pad_cols(w):
        return jnp.pad(w, [(0, 0)] * (w.ndim - 1) + [(0, out_w_pad - out_w)])

    W_num_p = pad_cols(to_out_cols(W_num_nat))                           # (n_num, out_w_pad)
    W_cat_p = pad_cols(to_out_cols(W_cat_nat))                           # (vocab, out_w_pad)
    W_cat_p = jnp.pad(W_cat_p, ((0, vocab_pad - vocab), (0, 0)))         # (vocab_pad, out_w_pad)
    b_p = pad_cols(to_out_cols(b_nat)[None, :])                          # (1, out_w_pad)

    # Per-tile VMEM at bt=1024 is only a few MiB -> default scoped VMEM limit
    # is plenty on v5e/v6e/v7x; raise vmem_limit_bytes only if bt is pushed
    # to 2048-4096 on v5e/v6e.
    grid = (B_pad // bt,)
    out_flat = pl.pallas_call(
        _cond_gen_kernel,
        out_shape=jax.ShapeDtypeStruct((B_pad, out_w_pad), jnp.float32),
        grid_spec=pltpu.PrefetchScalarGridSpec(
            num_scalar_prefetch=0,
            grid=grid,
            in_specs=[
                pl.BlockSpec((bt, n_num), lambda i: (i, 0)),             # num_x
                pl.BlockSpec((bt, n_cat), lambda i: (i, 0)),             # cat ids
                pl.BlockSpec((n_num, out_w_pad), lambda i: (0, 0)),      # numeric weight
                pl.BlockSpec((vocab_pad, out_w_pad), lambda i: (0, 0)),  # fused cat weight
                pl.BlockSpec((1, out_w_pad), lambda i: (0, 0)),          # fused bias
            ],
            out_specs=pl.BlockSpec((bt, out_w_pad), lambda i: (i, 0)),
        ),
        compiler_params=pltpu.CompilerParams(
            dimension_semantics=("parallel",)),
    )(num_x, cat_ids, W_num_p, W_cat_p, b_p)

    # Free row-major reshape only; column order is already (n_cond, n_feat).
    return out_flat[:B, :out_w].reshape(B, n_cond, n_feat)


def reference(x, params, numerical_index, categorical_index, categorical_offset):
    """Pure-JAX reference reproducing the PyTorch module exactly."""
    num_x = x[:, jnp.asarray(numerical_index)].astype(jnp.float32)
    num_out = jax.nn.sigmoid(num_x[:, :, None] * params['w_num'][None]
                             + params['b_num'][None])
    cat_ids = x[:, jnp.asarray(categorical_index)].astype(jnp.int32) \
        + categorical_offset[None, :]
    e = params['emb'][cat_ids]
    mean = e.mean(-1, keepdims=True)
    var = ((e - mean) ** 2).mean(-1, keepdims=True)
    normed = (e - mean) / jnp.sqrt(var + EPS)
    normed = normed * params['gamma'][None] + params['beta'][None]
    cat_out = jax.nn.sigmoid(
        jnp.einsum('bgi,goi->bgo', normed, params['W_cat']) + params['b_cat'][None])
    m = jnp.concatenate([num_out, cat_out], axis=1)
    return jnp.transpose(m, (0, 2, 1))


if __name__ == "__main__":
    # Feature spec: -1 == numerical, >0 == categorical cardinality.
    category_column_count = [-1, 3, -1, 5, -1, 4, -1, 6]
    numerical_index = [i for i, c in enumerate(category_column_count) if c == -1]
    categorical_index = [i for i, c in enumerate(category_column_count) if c != -1]
    categorical_count = [c for c in category_column_count if c != -1]
    categorical_offset = jnp.asarray(
        [0] + np.cumsum(categorical_count).tolist()[:-1], dtype=jnp.int32)

    n_num, n_cat = len(numerical_index), len(categorical_index)
    n_cond = 32
    vocab = int(sum(categorical_count))
    B = 16

    key = jax.random.PRNGKey(0)
    keys = jax.random.split(key, 10)

    # Deterministic synthetic parameters (shapes follow the module's __init__).
    params = {
        # FastGroupConv1d(n_num, n_num*n_cond, groups=n_num): weight (n_num*n_cond,1,1)
        'w_num': jax.random.normal(keys[0], (n_num, n_cond), jnp.float32) * 0.5,
        'b_num': jax.random.normal(keys[1], (n_num, n_cond), jnp.float32) * 0.1,
        # nn.Embedding(sum(counts), n_cond)
        'emb': jax.random.normal(keys[2], (vocab, n_cond), jnp.float32),
        # nn.GroupNorm(n_cat, n_cat*n_cond) affine params
        'gamma': 1.0 + 0.1 * jax.random.normal(keys[3], (n_cat, n_cond), jnp.float32),
        'beta': 0.1 * jax.random.normal(keys[4], (n_cat, n_cond), jnp.float32),
        # FastGroupConv1d(n_cat*n_cond, n_cat*n_cond, groups=n_cat): weight (n_cat*n_cond, n_cond, 1)
        'W_cat': jax.random.normal(keys[5], (n_cat, n_cond, n_cond), jnp.float32) * 0.2,
        'b_cat': jax.random.normal(keys[6], (n_cat, n_cond), jnp.float32) * 0.1,
    }

    # Input: numerical columns ~ N(0,1), categorical columns are integer codes.
    x = jnp.zeros((B, len(category_column_count)), jnp.float32)
    x = x.at[:, jnp.asarray(numerical_index)].set(
        jax.random.normal(keys[7], (B, n_num), jnp.float32))
    cat_vals = jnp.stack(
        [jax.random.randint(jax.random.fold_in(keys[8], j), (B,), 0, c)
         for j, c in enumerate(categorical_count)], axis=1).astype(jnp.float32)
    x = x.at[:, jnp.asarray(categorical_index)].set(cat_vals)

    out = condition_generation(x, params, numerical_index, categorical_index,
                               categorical_offset, n_cond=n_cond)
    out = jax.block_until_ready(out)

    ref = reference(x, params, numerical_index, categorical_index, categorical_offset)
    np.testing.assert_allclose(np.asarray(out), np.asarray(ref), rtol=2e-3, atol=2e-3)
    assert out.shape == (B, n_cond, n_num + n_cat)

    print("KERNEL_OK")
</pallas_src>

<mosaic_0001>
module attributes {stable_mosaic.version = 11 : i64} {
  func.func @_cond_gen_kernel(%arg0: i32, %arg1: memref<8x4xf32, #tpu.memory_space<vmem>>, %arg2: memref<8x4xi32, #tpu.memory_space<vmem>>, %arg3: memref<4x256xf32, #tpu.memory_space<vmem>>, %arg4: memref<24x256xf32, #tpu.memory_space<vmem>>, %arg5: memref<1x256xf32, #tpu.memory_space<vmem>>, %arg6: memref<8x256xf32, #tpu.memory_space<vmem>>) attributes {dimension_semantics = [#tpu.dimension_semantics<parallel>], iteration_bounds = array<i64: 2>, scalar_prefetch = 0 : i64, scratch_operands = 0 : i64, tpu.core_type = #tpu.core_type<tc>, window_params = [{transform_indices = @transform_0, window_bounds = array<i64: 8, 4>}, {transform_indices = @transform_1, window_bounds = array<i64: 8, 4>}, {pipeline_mode = #tpu.pipeline_mode<synchronous>, transform_indices = @transform_2, window_bounds = array<i64: 4, 256>}, {pipeline_mode = #tpu.pipeline_mode<synchronous>, transform_indices = @transform_3, window_bounds = array<i64: 24, 256>}, {pipeline_mode = #tpu.pipeline_mode<synchronous>, transform_indices = @transform_4, window_bounds = array<i64: 1, 256>}, {transform_indices = @transform_5, window_bounds = array<i64: 8, 256>}]} {
    %c0 = arith.constant 0 : index
    %c0_0 = arith.constant 0 : index
    %0 = vector.load %arg1[%c0, %c0_0] : memref<8x4xf32, #tpu.memory_space<vmem>>, vector<8x4xf32>
    %c0_1 = arith.constant 0 : index
    %c0_2 = arith.constant 0 : index
    %1 = vector.load %arg3[%c0_1, %c0_2] : memref<4x256xf32, #tpu.memory_space<vmem>>, vector<4x256xf32>
    %cst = arith.constant dense<0.000000e+00> : vector<8x256xf32>
    %2 = tpu.matmul %0, %1, %cst {dimension_numbers = #tpu.dot_dimension_numbers<[1], [0], [0], [1], [0, 0, 1, 1], [], []>} : vector<8x4xf32>, vector<4x256xf32>, vector<8x256xf32> -> vector<8x256xf32>
    %c0_3 = arith.constant 0 : index
    %c0_4 = arith.constant 0 : index
    %3 = vector.load %arg2[%c0_3, %c0_4] : memref<8x4xi32, #tpu.memory_space<vmem>>, vector<8x4xi32>
    %4 = tpu.iota {dimensions = array<i32: 1>} : vector<8x24xi32>
    %5 = vector.extract_strided_slice %3 {offsets = [0, 0], sizes = [8, 1], strides = [1, 1]} : vector<8x4xi32> to vector<8x1xi32>
    %6 = vector.broadcast %5 : vector<8x1xi32> to vector<8x24xi32>
    %7 = arith.cmpi eq, %6, %4 : vector<8x24xi32>
    %8 = arith.extui %7 : vector<8x24xi1> to vector<8x24xi32>
    %9 = arith.sitofp %8 : vector<8x24xi32> to vector<8x24xf32>
    %10 = vector.extract_strided_slice %3 {offsets = [0, 1], sizes = [8, 1], strides = [1, 1]} : vector<8x4xi32> to vector<8x1xi32>
    %11 = vector.broadcast %10 : vector<8x1xi32> to vector<8x24xi32>
    %12 = arith.cmpi eq, %11, %4 : vector<8x24xi32>
    %13 = arith.extui %12 : vector<8x24xi1> to vector<8x24xi32>
    %14 = arith.sitofp %13 : vector<8x24xi32> to vector<8x24xf32>
    %15 = arith.addf %9, %14 : vector<8x24xf32>
    %16 = vector.extract_strided_slice %3 {offsets = [0, 2], sizes = [8, 1], strides = [1, 1]} : vector<8x4xi32> to vector<8x1xi32>
    %17 = vector.broadcast %16 : vector<8x1xi32> to vector<8x24xi32>
    %18 = arith.cmpi eq, %17, %4 : vector<8x24xi32>
    %19 = arith.extui %18 : vector<8x24xi1> to vector<8x24xi32>
    %20 = arith.sitofp %19 : vector<8x24xi32> to vector<8x24xf32>
    %21 = arith.addf %15, %20 : vector<8x24xf32>
    %22 = vector.extract_strided_slice %3 {offsets = [0, 3], sizes = [8, 1], strides = [1, 1]} : vector<8x4xi32> to vector<8x1xi32>
    %23 = vector.broadcast %22 : vector<8x1xi32> to vector<8x24xi32>
    %24 = arith.cmpi eq, %23, %4 : vector<8x24xi32>
    %25 = arith.extui %24 : vector<8x24xi1> to vector<8x24xi32>
    %26 = arith.sitofp %25 : vector<8x24xi32> to vector<8x24xf32>
    %27 = arith.addf %21, %26 : vector<8x24xf32>
    %c0_5 = arith.constant 0 : index
    %c0_6 = arith.constant 0 : index
    %28 = vector.load %arg4[%c0_5, %c0_6] : memref<24x256xf32, #tpu.memory_space<vmem>>, vector<24x256xf32>
    %cst_7 = arith.constant dense<0.000000e+00> : vector<8x256xf32>
    %29 = tpu.matmul %27, %28, %cst_7 {dimension_numbers = #tpu.dot_dimension_numbers<[1], [0], [0], [1], [0, 0, 1, 1], [], []>} : vector<8x24xf32>, vector<24x256xf32>, vector<8x256xf32> -> vector<8x256xf32>
    %30 = arith.addf %2, %29 : vector<8x256xf32>
    %c0_8 = arith.constant 0 : index
    %c0_9 = arith.constant 0 : index
    %31 = vector.load %arg5[%c0_8, %c0_9] : memref<1x256xf32, #tpu.memory_space<vmem>>, vector<1x256xf32>
    %32 = vector.broadcast %31 : vector<1x256xf32> to vector<8x256xf32>
    %33 = arith.addf %30, %32 : vector<8x256xf32>
    %34 = arith.negf %33 : vector<8x256xf32>
    %35 = math.exp %34 : vector<8x256xf32>
    %cst_10 = arith.constant 1.000000e+00 : f32
    %36 = vector.broadcast %cst_10 : f32 to vector<8x256xf32>
    %37 = arith.addf %36, %35 : vector<8x256xf32>
    %38 = arith.divf %36, %37 : vector<8x256xf32>
    %c0_11 = arith.constant 0 : index
    %c0_12 = arith.constant 0 : index
    %39 = vector.load %arg6[%c0_11, %c0_12] : memref<8x256xf32, #tpu.memory_space<vmem>>, vector<8x256xf32>
    tpu.vector_store %arg6[%c0_11, %c0_12], %38 {strides = array<i32>} : memref<8x256xf32, #tpu.memory_space<vmem>>, vector<8x256xf32>,
    return
  }
  func.func @transform_0(%arg0: i32) -> (i32, i32) {
    %c0_i32 = arith.constant 0 : i32
    %c0_i32_0 = arith.constant 0 : i32
    return %arg0, %c0_i32 : i32, i32
  }
  func.func @transform_1(%arg0: i32) -> (i32, i32) {
    %c0_i32 = arith.constant 0 : i32
    %c0_i32_0 = arith.constant 0 : i32
    return %arg0, %c0_i32 : i32, i32
  }
  func.func @transform_2(%arg0: i32) -> (i32, i32) {
    %c0_i32 = arith.constant 0 : i32
    %c0_i32_0 = arith.constant 0 : i32
    %c0_i32_1 = arith.constant 0 : i32
    return %c0_i32, %c0_i32_0 : i32, i32
  }
  func.func @transform_3(%arg0: i32) -> (i32, i32) {
    %c0_i32 = arith.constant 0 : i32
    %c0_i32_0 = arith.constant 0 : i32
    %c0_i32_1 = arith.constant 0 : i32
    return %c0_i32, %c0_i32_0 : i32, i32
  }
  func.func @transform_4(%arg0: i32) -> (i32, i32) {
    %c0_i32 = arith.constant 0 : i32
    %c0_i32_0 = arith.constant 0 : i32
    %c0_i32_1 = arith.constant 0 : i32
    return %c0_i32, %c0_i32_0 : i32, i32
  }
  func.func @transform_5(%arg0: i32) -> (i32, i32) {
    %c0_i32 = arith.constant 0 : i32
    %c0_i32_0 = arith.constant 0 : i32
    return %arg0, %c0_i32 : i32, i32
  }
}

</mosaic_0001>

<bundles_post_ra>
// kernel: tpu_custom_call.1
= control target key start
LH: loop header
LB: loop body
LE: loop exit
PB: predicated region body
PF: predicated region fallthrough
CT: control target
= control target key end

     0   :  { %10 = vsyncpa [#allocation3], 0  ;;  %s966_s0 = inlined_call_operand.vmem [shape: f32[16,4], index: 0, kind: input, shape index: {}]   ;;  %s967_s1 = inlined_call_operand.vmem [shape: s32[16,4], index: 1, kind: input, shape index: {}]   ;;  %s968_s2 = inlined_call_operand.hbm [shape: f32[4,256], index: 2, kind: input, shape index: {}]   ;;  %s969_s3 = inlined_call_operand.vmem [shape: f32[24,256], index: 3, kind: input, shape index: {}]   ;;  %s970_s4 = inlined_call_operand.vmem [shape: f32[1,256], index: 4, kind: input, shape index: {}]   ;;  %s971_s5 = inlined_call_operand.hbm [shape: f32[16,256], index: 5, kind: output, shape index: {}]  }
   0x1   :  { %11 = vsyncpa [#allocation4], 0 }
   0x2   :  { %13 = vsyncpa [#allocation4 + $0x1], 0  ;;  %s804_s18 = smov 0   ;;  %s806_s19 = smov 0  }
   0x3   :  { %s808_s20 = smov 0   ;;  %s810_s21 = smov 0  }
   0x4 LB: > { %s825_s22 = sadd.s32 4294967295, %s765_s21   ;;  %s571_s23 = sadd.s32 4294967294, %s765_s21   ;;  %s765_s21 = sphi %s810_s21, %s987_s21   ;;  %s761_s20 = sphi %s808_s20, %s986_s20   ;;  %s757_s19 = sphi %s806_s19, %s985_s19   ;;  %s753_s18 = sphi %s804_s18, %s984_s18  }
   0x5   : > { %s829_s24 = sadd.s32 1, %s765_s21   ;;  %s141_s25 = sadd.s32 1, %s761_s20 }
   0x6   : > { %s138_s26 = ssub.s32 %s765_s21, %s829_s24  ;;  %p151_p0 = scmp.ne.s32.totalorder %s761_s20, %s757_s19 }
   0x7   : > { %p139_p1 = scmp.eq.s32.totalorder %s138_s26, 0  ;;  %p152_p2 = scmp.eq.s32.totalorder %s825_s22, 1 }
   0x8   : > { %p157_p3 = scmp.ne.s32.totalorder %s757_s19, %s753_s18  ;;  %p158_p4 = scmp.eq.s32.totalorder %s571_s23, 1 }
   0x9   : > { %s840_s27 = scalar_select %p139_p1, %s761_s20, %s141_s25  }
   0xa   : > { %p842_p5 = por %p152_p2, %p151_p0  ;;  %p846_p6 = por %p158_p4, %p157_p3 }
   0xb   : > { %p572_p7 = scmp.ge.s32.totalorder %s765_s21, 1  ;;  %p165_p8 = scmp.lt.s32.totalorder %s765_s21, 3 }
   0xc   : > { %s975_s28 = scalar_select %p842_p5, 1, 0 }
   0xd   : > { %s976_s29 = scalar_select %p846_p6, 1, 0 }
   0xe   : > { %p972_p9 = scmp.eq.s32.totalorder %s825_s22, 0  ;;  %p853_p10 = pnand %p572_p7, %p165_p8 }
   0xf   : > { %s767_s6 = smov [#allocation2]   ;;  %s671_s11 = scalar_lea.hbm %s968_s2, 128 }
  0x10   : > { %s977_s30 = scalar_select %p853_p10, 1, 0 }
  0x11   : > { %s178_s7 = sshll.u32 %s767_s6, 4  ;;  %p608_p11 = pneg %p853_p10  ;;  %s179_s7 = int_to_ptr.vmem [resolvable:$true] %s178_s7 }
  0x12   : > { %p672_p13 = scmp.ne.s32.totalorder %s968_s2, %s671_s11  ;;  %p678_p3 = scmp.lt.u32.totalorder %s671_s11, %s968_s2 }
  0x13   : > { %p861_p12 = pnand %p972_p9, %p608_p11 }
  0x15   : > { %p673_p0 = pneg %p861_p12 }
  0x17   : > { %p674_p1 = pnand %p673_p0, %p672_p13 }
  0x19   : > { %p675_p2 = pneg %p674_p1 }
  0x1b   : > { %p680_p4 = pnand %p678_p3, %p675_p2 }
  0x1d   : > { %683 = shalt.err (!%p680_p4)
}
  0x1e   : > { %s684_s16 = scalar_lea.vmem %s179_s7, 128  ;;  %p692_p9 = scmp.lt.s32.totalorder %s179_s7, %s179_s7 }
  0x1f   : > { %p685_p7 = scmp.ne.s32.totalorder %s179_s7, %s684_s16  ;;  %p693_p6 = scmp.lt.s32.totalorder %s684_s16, %s684_s16 }
  0x21   : > { %p687_p8 = pnand %p685_p7, %p673_p0  ;;  %p694_p5 = por %p693_p6, %p692_p9 }
  0x23   : > { %p688_p11 = pneg %p687_p8 }
  0x25   : > { %p695_p10 = pnand %p694_p5, %p688_p11 }
  0x27   : > { %698 = shalt.err (!%p695_p10)
}
  0x28   : > { %611 = dma.hbm_to_vmem [thread:$0]  (!%p861_p12), %s968_s2, 128, %s179_s7, [#allocation3]  }
  0x29   : > { %p979_p13 = scmp.ne.s32.totalorder %s977_s30, 0 }
  0x2a   : > { %p980_p1 = scmp.eq.s32.totalorder (!%p979_p13), %s825_s22, 0 }
  0x2b   : > { %211 = sbr.rel (%p979_p13) target bundleno = 456 (0x1c8), region = 40 }
  0x32   : > { %744 = dma.done.wait (%p980_p1), [#allocation3], 128   ;;  %p981_p0 = pmov %p980_p1 }
  0x33   : > { %p242_p6 = scmp.lt.s32.totalorder %s825_s22, 1  ;;  %v768_v0 = vmov 0   ;;  %v769_v1 = vmov 2   ;;  %v770_v2 = vmov 0.0   ;;  %v771_v4 = vmov 1   ;;  %v283_v6 = vld [vmem:[%s969_s3 + $0x8] sm:$0xff] }
  0x34   : > { %746 = vsyncadd (%p981_p0), [#allocation3], 4294967168  ;;  %657 = vset.pattern.permute.xlu0 %v768_v0  ;;  %659 = vset.pattern.permute.xlu1 %v769_v1  ;;  %v772_v5 = vmov 3   ;;  %v285_v7 = vld [vmem:[%s969_s3 + $0x18] sm:$0xff]  ;;  %v282_v9 = vld [vmem:[%s969_s3] sm:$0xff]  ;;  %vm369_vm0 = vcmask 1043456   ;;  %v253_v17 = vlaneseq }
  0x35   : > { %s889_s25 = scalar_select %p242_p6, %s825_s22, 1  ;;  %438 = vmatprep.mubr.f32.mxu0 %v770_v2  ;;  %356 = vmatprep.mubr.f32.mxu1 %v770_v2  ;;  %v596_v8 = vpack.c.bf16 %v285_v7, %v283_v6  ;;  %v284_v10 = vld [vmem:[%s969_s3 + $0x10] sm:$0xff]  ;;  %v251_v12 = vld [vmem:[#allocation2] sm:$0xff]  ;;  %v287_v14 = vld [vmem:[%s969_s3 + $0x28] sm:$0xff]  ;;  %vm365_vm1 = vcmask 31744   ;;  %vm288_vm6 = vcmask 195584  }
  0x36   : > { %v598_v11 = vpack.c.bf16 %v284_v10, %v282_v9  ;;  %v364_v13 = vcombine.high %v251_v12, %v251_v12  ;;  %v286_v15 = vld [vmem:[%s969_s3 + $0x20] sm:$0xff]  ;;  %v254_v18 = vand.u32 127, %v253_v17  ;;  %v448_v32 = vshrl.u32 %v253_v17, 7  ;;  %s239_s9 = sand.u32 1, %s757_s19   ;;  %s595_s11 = sshll.u32 %s825_s22, 8 }
  0x37   : > { %s578_s26 = sshll.u32 %s889_s25, 3  ;;  %597 = vmatprep.subr.bf16.mxu1 %v596_v8  ;;  %v445_v34 = vld [vmem:[%s970_s4] sm:$0x3]  ;;  %s577_s10 = sshll.u32 %s239_s9, 4 }
  0x38   : > { %s249_s7 = scalar_lea.vmem %s967_s1, %s578_s26  ;;  %599 = vmatpush1.bf16.msra.mxu1 %v598_v11  ;;  %585 = vmatprep.subr.msk.mxu0 %vm369_vm0, %v364_v13  ;;  %s245_s30 = scalar_lea.vmem %s966_s0, %s578_s26  ;;  %v449_v33 = vsub.s32 0, %v448_v32  ;;  %v453_v35 = vsub.s32 1, %v448_v32 }
  0x39   : > { %v252_v3 = vld [vmem:[%s249_s7] sm:$0xff]  ;;  %296 = vmatprep.subr.mxu1 %v287_v14  ;;  %586 = vmatpush1.msk.msra.mxu0 %vm369_vm0, %v251_v12  ;;  %s241_s12 = scalar_lea.vmem [#allocation5], %s577_s10  ;;  %s924_s16 = scalar_lea.hbm %s971_s5, %s595_s11 }
  0x3a   : > { %256 = vperm.xlu0 %657, %v252_v3   ;;  %269 = vperm.xlu1 %659, %v252_v3   ;;  %v250_v16 = vld [vmem:[%s245_s30] sm:$0xff]  ;;  %v450_v36 = vrot.slane %v445_v34, %v449_v33  ;;  %v454_v38 = vrot.slane %v445_v34, %v453_v35  ;;  %s488_s13 = sshll.u32 %s241_s12, 4  ;;  %s474_s17 = scalar_lea.sflag [#allocation4], %s239_s9  ;;  %s926_s13 = int_to_ptr.vmem [resolvable:$true] %s488_s13 }
  0x3b   : > { %587 = vmatmul.mubr.msk.f32.vlgmr.msra.gmra.mrb[0].mxu0 %vm365_vm1, %v250_v16  ;;  %s699_s23 = scalar_lea.vmem %s926_s13, 256  ;;  %p982_p9 = scmp.ne.s32.totalorder %s975_s28, 0 }
  0x3c   : > { %297 = vmatpush1.msra.mxu1 %v286_v15  ;;  %p700_p5 = scmp.ne.s32.totalorder %s926_s13, %s699_s23  ;;  %s773_s22 = smov [#allocation5]  }
  0x3d   : > { %s703_s25 = sshll.u32 %s773_s22, 4  ;;  %s704_s25 = int_to_ptr.vmem [resolvable:$false] %s703_s25 }
  0x3e   : > { %658 = vset.pattern.permute.xlu0 %v771_v4  ;;  %660 = vset.pattern.permute.xlu1 %v772_v5  ;;  %p701_p10 = pnand %p700_p5, %p982_p9  ;;  %s705_s30 = scalar_lea.vmem %s704_s25, 512 }
  0x3f   : > { %262 = vperm.xlu0 %658, %v252_v3   ;;  %276 = vperm.xlu1 %660, %v252_v3   ;;  %p706_p2 = scmp.lt.s32.totalorder %s926_s13, %s704_s25  ;;  %p707_p3 = scmp.lt.s32.totalorder %s705_s30, %s699_s23 }
  0x40   : > { %p702_p12 = pneg %p701_p10 }
  0x41   : > { %p708_p4 = por %p707_p3, %p706_p2 }
  0x43   : > { %661 = vset.pattern.permute.xlu0 %v772_v5  ;;  %p709_p7 = pnand %p708_p4, %p702_p12 }
  0xb9   : > { %v257_v19 = vpop.permute.xlu0 %256  ;;  %v270_v20 = vpop.permute.xlu1 %269 }
  0xba   : > { %vm258_vm2 = vcmp.eq.s32.totalorder %v257_v19, %v254_v18  ;;  %vm271_vm3 = vcmp.eq.s32.totalorder %v270_v20, %v254_v18 }
  0xbb   : > { %v580_v23 = vsel %vm258_vm2, 1.0, %v770_v2  ;;  %v582_v26 = vsel %vm271_vm3, 1.0, %v770_v2 }
  0xbe   : > { %v263_v21 = vpop.permute.xlu0 %262  ;;  %v277_v22 = vpop.permute.xlu1 %276 }
  0xbf   : > { %vm264_vm4 = vcmp.eq.s32.totalorder %v263_v21, %v254_v18  ;;  %vm278_vm5 = vcmp.eq.s32.totalorder %v277_v22, %v254_v18 }
  0xc0   : > { %v581_v24 = vsel %vm264_vm4, 1.0, %v770_v2  ;;  %v583_v27 = vsel %vm278_vm5, 1.0, %v770_v2 }
  0xc1   : > { %v267_v25 = vadd.f32 %v581_v24, %v580_v23 }
  0xc3   : > { %v274_v28 = vadd.f32 %v582_v26, %v267_v25 }
  0xc5   : > { %v281_v29 = vadd.f32 %v583_v27, %v274_v28 }
  0xc7   : > { %584 = vmatmul.mubr.msk.f32.vlgmr.msra.gmra.mrb[0].mxu1 %vm288_vm6, %v281_v29 }
 0x10e   : > { %v440_v30 = vpop.f32.mrb[0].mxu0 }
 0x10f   : > { %v442_v31 = vpop.f32.mrb[1].mxu0 }
 0x19a   : > { %v358_v37 = vpop.f32.mrb[0].mxu1 }
 0x19b   : > { %v441_v39 = vadd.f32 %v440_v30, %v358_v37  ;;  %v360_v40 = vpop.f32.mrb[1].mxu1 }
 0x19c   : > { %v443_v41 = vadd.f32 %v442_v31, %v360_v40 }
 0x19d   : > { %v457_v42 = vadd.f32 %v450_v36, %v441_v39 }
 0x19e   : > { %v458_v43 = vadd.f32 %v454_v38, %v443_v41 }
 0x19f   : > { %v588_v44 = vmul.f32 -1.442695, %v457_v42 }
 0x1a0   : > { %v589_v45 = vmul.f32 -1.442695, %v458_v43 }
 0x1a1   : > { %663 = vpow2.f32 %v588_v44 }
 0x1a2   : > { %665 = vpow2.f32 %v589_v45 }
 0x1ab   : > { %v664_v46 = vpop.eup %663 }
 0x1ac   : > { %v666_v47 = vpop.eup %665  ;;  %v465_v48 = vadd.f32 1.0, %v664_v46 }
 0x1ad   : > { %v466_v49 = vadd.f32 1.0, %v666_v47 }
 0x1ae   : > { %667 = vrcp.f32 %v465_v48 }
 0x1af   : > { %669 = vrcp.f32 %v466_v49 }
 0x1b8   : > { %v668_v50 = vpop.eup %667 }
 0x1b9   : > { %v670_v51 = vpop.eup %669  ;;  %471 = vst [vmem:[%s241_s12] sm:$0xff] %v668_v50 }
 0x1ba   : > { %472 = vst [vmem:[%s241_s12 + $0x8] sm:$0xff] %v670_v51 }
 0x1bb   : > { %712 = shalt.err (!%p709_p7)
}
 0x1bc   : > { %s713_s6 = scalar_lea.hbm %s924_s16, 256  ;;  %s717_s8 = scalar_lea.hbm %s971_s5, 512 }
 0x1bd   : > { %p714_p8 = scmp.ne.s32.totalorder %s924_s16, %s713_s6  ;;  %p718_p1 = scmp.lt.u32.totalorder %s924_s16, %s971_s5 }
 0x1be   : > { %p719_p0 = scmp.lt.u32.totalorder %s717_s8, %s713_s6  ;;  %p721_p5 = scmp.lt.u32.totalorder %s713_s6, %s924_s16 }
 0x1bf   : > { %p715_p11 = pnand %p714_p8, %p982_p9 }
 0x1c0   : > { %p720_p6 = por %p719_p0, %p718_p1 }
 0x1c1   : > { %p716_p13 = pneg %p715_p11 }
 0x1c2   : > { %p722_p10 = por %p721_p5, %p720_p6 }
 0x1c4   : > { %p723_p12 = pnand %p722_p10, %p716_p13 }
 0x1c6   : > { %726 = shalt.err (!%p723_p12)
}
 0x1c7   : > { %606 = dma.vmem_to_hbm [thread:$0]  (%p982_p9), %s926_s13, 256, %s924_s16, %s474_s17  }
 0x1c8 PF: > { %p618_p2 = scmp.ge.s32.totalorder %s765_s21, 2  ;;  %s500_s11 = sand.u32 1, %s753_s18  }
 0x1c9   : > { %p983_p3 = scmp.ne.s32.totalorder %s976_s29, 0  ;;  %s501_s12 = scalar_lea.sflag [#allocation4], %s500_s11 }
 0x1cb   : > { %p613_p4 = pnand %p618_p2, %p983_p3 }
 0x1cd   : > { %748 = dma.done.wait (!%p613_p4), %s501_s12, 256  }
 0x1ce   : > { %750 = vsyncadd (!%p613_p4), %s501_s12, 4294967040  ;;  %p16_p7 = scmp.ge.s32.totalorder %s829_s24, 4   ;;  %s984_s18 = smov %s757_s19 }
 0x1cf   : > { %s985_s19 = smov %s761_s20  ;;  %s986_s20 = smov %s840_s27 }
 0x1d0   : > { %s987_s21 = smov %s829_s24  ;;  %18 = sbr.rel (!%p16_p7) target bundleno = 4 (0x4), region = 83 }
 0x1d7   :  { %506 = vsyncpa [#allocation3], 1 }
 0x1d8   :  { %508 = vsyncpa [#allocation3 + $0x1], 1 }
 0x1d9   :  { %509 = vsyncpa [#allocation4], 1 }
 0x1da   :  { %511 = vsyncpa [#allocation4 + $0x1], 1 }

</bundles_post_ra>
